<compile_context>
chip_gen: v7x
topology: tpu7x:2x2x1
jax: 0.10.0
libtpu: 0.0.40
codegen_flags: <defaults>
</compile_context>

<pallas_src>
import functools

import jax
import jax.numpy as jnp
from jax import lax
from jax.experimental import pallas as pl
from jax.experimental.pallas import tpu as pltpu


def _round_up(x, m):
    return (x + m - 1) // m * m


def _pad_and_tile(dim, granule, max_tile):
    """Pad `dim` to a tileable extent; return (padded_dim, tile_size)."""
    assert max_tile % granule == 0
    padded = _round_up(dim, granule)
    if padded <= max_tile:
        return padded, padded
    return _round_up(dim, max_tile), max_tile


# ----------------------------------------------------------------------------
# Pallas kernel: one RelGraphConv (basis regularizer) layer.
# grid = (num_dst_tiles, num_src_tiles); the src axis is the reduction.
# Per step: B adjacency @ x matmuls accumulate into a packed (TNd, B*IN_p)
# f32 scratch; on the last src step one packed-basis matmul + bias (+ReLU)
# writes the output tile exactly once.
# ----------------------------------------------------------------------------
def _rgcn_layer_kernel(adj_ref,    # VMEM (B, TNd, TNs)   bf16 coeff-combined adjacency
                       x_ref,      # VMEM (TNs, IN_p)     bf16 source features
                       wpk_ref,    # VMEM (B*IN_p, OUT_p) bf16 packed basis weights
                       bias_ref,   # VMEM (1, OUT_p)      f32
                       out_ref,    # VMEM (TNd, OUT_p)    f32
                       agg_ref,    # VMEM (TNd, B*IN_p)   f32 scratch accumulator
                       *, apply_relu, num_bases, in_p):
    s = pl.program_id(1)

    @pl.when(s == 0)
    def _():
        agg_ref[...] = jnp.zeros_like(agg_ref)

    x = x_ref[...]                       # loaded once; reused for all bases
    for b in range(num_bases):           # static unroll (B is small & static)
        agg_ref[:, b * in_p:(b + 1) * in_p] += jnp.dot(
            adj_ref[b], x, preferred_element_type=jnp.float32)

    @pl.when(s == pl.num_programs(1) - 1)
    def _():
        # Single packed matmul performs the sum over bases; f32 epilogue.
        res = jnp.dot(agg_ref[...].astype(wpk_ref.dtype), wpk_ref[...],
                      preferred_element_type=jnp.float32) + bias_ref[...]
        if apply_relu:
            res = jnp.maximum(res, 0.0)
        out_ref[...] = res.astype(out_ref.dtype)


def rel_graph_conv(adj, x, coeff, bases, bias, *, apply_relu,
                   mxu_dtype=jnp.bfloat16, max_dst_tile=512, max_src_tile=1024):
    """One CuGraphRelGraphConv(regularizer='basis', self_loop=False) layer.

    adj:   (R, Nd, Ns) dense per-relation normalized adjacency
    x:     (Ns, IN) source-node features
    coeff: (R, B) basis coefficients, bases: (B, IN, OUT), bias: (1, OUT)
    """
    R, Nd, Ns = adj.shape
    B, IN, OUT = bases.shape
    assert x.shape == (Ns, IN) and coeff.shape == (R, B) and bias.shape == (1, OUT)

    # dtype-aware padding / tiling (zero padding is exact for this linear map).
    # NOTE(v7x): for large graphs pick TNd so Nd_p // TNd is even, otherwise one
    # TensorCore idles on the 'parallel' dst axis.
    Nd_p, TNd = _pad_and_tile(Nd, 16, max_dst_tile)    # bf16 sublane granule
    Ns_p, TNs = _pad_and_tile(Ns, 128, max_src_tile)   # lane granule
    IN_p = _round_up(IN, 128)
    OUT_p = _round_up(OUT, 128)

    # Basis reassociation (A_b = sum_r coeff[r,b] * A_r), fused prep: convert to
    # bf16 in the dot epilogue, then pad the half-size bf16 array.
    adj_b = jnp.einsum("rb,rds->bds", coeff, adj).astype(mxu_dtype)
    adj_b = jnp.pad(adj_b, ((0, 0), (0, Nd_p - Nd), (0, Ns_p - Ns)))

    x_p = jnp.pad(x.astype(mxu_dtype), ((0, Ns_p - Ns), (0, IN_p - IN)))

    # Pack basis weights along the contraction axis: (B*IN_p, OUT_p); row block
    # b matches the b-th IN_p-column slice of the in-kernel agg accumulator.
    w_packed = jnp.pad(bases, ((0, 0), (0, IN_p - IN), (0, OUT_p - OUT)))
    w_packed = w_packed.reshape(B * IN_p, OUT_p).astype(mxu_dtype)

    bias_p = jnp.pad(bias.astype(jnp.float32), ((0, 0), (0, OUT_p - OUT)))

    kernel = functools.partial(_rgcn_layer_kernel, apply_relu=apply_relu,
                               num_bases=B, in_p=IN_p)
    grid = (Nd_p // TNd, Ns_p // TNs)    # reduction (src) axis last

    out = pl.pallas_call(
        kernel,
        out_shape=jax.ShapeDtypeStruct((Nd_p, OUT_p), jnp.float32),
        grid_spec=pltpu.PrefetchScalarGridSpec(
            num_scalar_prefetch=0,
            grid=grid,
            in_specs=[
                # All B combined-adjacency tiles for this (dst, src) tile.
                pl.BlockSpec((B, TNd, TNs), lambda d, s: (0, d, s)),
                # x fetched once per (dst, src) tile (no per-basis refetch).
                pl.BlockSpec((TNs, IN_p), lambda d, s: (s, 0)),
                # Packed basis weights: constant block, resident in VMEM.
                pl.BlockSpec((B * IN_p, OUT_p), lambda d, s: (0, 0)),
                pl.BlockSpec((1, OUT_p), lambda d, s: (0, 0)),
            ],
            out_specs=pl.BlockSpec((TNd, OUT_p), lambda d, s: (d, 0)),
            scratch_shapes=[pltpu.VMEM((TNd, B * IN_p), jnp.float32)],
        ),
        compiler_params=pltpu.CompilerParams(
            # dst tiles split across TensorCores (v7x megacore); src axis is the
            # reduction into the resident agg scratch.
            dimension_semantics=("parallel", "arbitrary"),
            # Sized for v7x (64 MiB physical VMEM); ample headroom on v5e/v6e.
            vmem_limit_bytes=48 * 1024 * 1024,
        ),
    )(adj_b, x_p, w_packed, bias_p)

    return out[:Nd, :OUT]


# ----------------------------------------------------------------------------
# Glue: edge list -> dense per-relation normalized adjacency, embedding gather,
# and the two-layer RGCN forward.
# ----------------------------------------------------------------------------
def build_rel_adj(num_rels, num_dst, num_src, src, dst, etype, norm):
    # TODO(synk): dense adjacency streams mostly zeros at fanout 4; a
    # scalar-prefetch CSR gather + segment-sum kernel is the order-of-magnitude
    # lever for large graphs (formulation rewrite, not a tweak).
    adj = jnp.zeros((num_rels, num_dst, num_src), jnp.float32)
    return adj.at[etype, dst, src].add(norm)


def rgcn_forward(params, src_nids, adj0, adj1):
    # TODO(synk): embedding lookup is a data-dependent row gather; kept in
    # plain JAX (a Pallas version needs a manual DMA-gather kernel).
    x = params["emb"][src_nids]                                       # (Ns0, H)
    h = rel_graph_conv(adj0, x, params["coeff1"], params["bases1"],
                       params["bias1"], apply_relu=True)              # (Nd0, H)
    h = rel_graph_conv(adj1, h, params["coeff2"], params["bases2"],
                       params["bias2"], apply_relu=False)             # (Nd1, O)
    return h


# ----------------------------------------------------------------------------
# Main: deterministic synthetic parameters + graph blocks, run, verify.
# ----------------------------------------------------------------------------
if __name__ == "__main__":
    num_nodes, h_dim, out_dim = 100, 32, 16
    num_rels, num_bases = 4, 2
    fanouts = [4, 4]
    num_src0, num_dst0, num_dst1 = 64, 32, 16
    num_src1 = num_dst0   # DGL MFG convention: layer-2 src nodes = layer-1 dst

    key = jax.random.PRNGKey(0)
    ks = jax.random.split(key, 12)

    params = {
        "emb":    jax.random.normal(ks[0], (num_nodes, h_dim), jnp.float32),
        "coeff1": jax.random.normal(ks[1], (num_rels, num_bases), jnp.float32),
        "bases1": 0.1 * jax.random.normal(ks[2], (num_bases, h_dim, h_dim), jnp.float32),
        "bias1":  0.01 * jax.random.normal(ks[3], (1, h_dim), jnp.float32),
        "coeff2": jax.random.normal(ks[4], (num_rels, num_bases), jnp.float32),
        "bases2": 0.1 * jax.random.normal(ks[5], (num_bases, h_dim, out_dim), jnp.float32),
        "bias2":  0.01 * jax.random.normal(ks[6], (1, out_dim), jnp.float32),
    }

    # Block 0 (layer-1 message-flow graph)
    src_nids = jax.random.randint(ks[7], (num_src0,), 0, num_nodes)
    E0 = num_dst0 * fanouts[0]
    src0 = jax.random.randint(ks[8], (E0,), 0, num_src0)
    dst0 = jnp.repeat(jnp.arange(num_dst0), fanouts[0])
    et0 = jax.random.randint(ks[9], (E0,), 0, num_rels)
    norm0 = jnp.full((E0,), 1.0 / fanouts[0], jnp.float32)

    # Block 1 (layer-2 message-flow graph)
    E1 = num_dst1 * fanouts[1]
    src1 = jax.random.randint(ks[10], (E1,), 0, num_src1)
    dst1 = jnp.repeat(jnp.arange(num_dst1), fanouts[1])
    et1 = jax.random.randint(ks[11], (E1,), 0, num_rels)
    norm1 = jnp.full((E1,), 1.0 / fanouts[1], jnp.float32)

    adj0 = build_rel_adj(num_rels, num_dst0, num_src0, src0, dst0, et0, norm0)
    adj1 = build_rel_adj(num_rels, num_dst1, num_src1, src1, dst1, et1, norm1)

    out = rgcn_forward(params, src_nids, adj0, adj1)
    out = jax.block_until_ready(out)
    assert out.shape == (num_dst1, out_dim)

    # Pure-JAX f32 reference (same math, dense formulation).
    def ref_layer(adj, x, coeff, bases, bias, relu):
        W = jnp.einsum("rb,bio->rio", coeff, bases,
                       precision=lax.Precision.HIGHEST)
        h = jnp.einsum("rds,si,rio->do", adj, x, W,
                       precision=lax.Precision.HIGHEST) + bias
        return jnp.maximum(h, 0.0) if relu else h

    x_ref = params["emb"][src_nids]
    h_ref = ref_layer(adj0, x_ref, params["coeff1"], params["bases1"],
                      params["bias1"], True)
    h_ref = ref_layer(adj1, h_ref, params["coeff2"], params["bases2"],
                      params["bias2"], False)

    # Kernel feeds the MXU bf16 operands (f32 accumulation), so the tolerance
    # vs. the all-f32 reference is correspondingly loosened.
    assert jnp.allclose(out, h_ref, atol=2e-2, rtol=2e-2), "mismatch vs reference"

    print("KERNEL_OK")
</pallas_src>

<mosaic_0001>
module attributes {stable_mosaic.version = 11 : i64} {
  func.func @_rgcn_layer_kernel(%arg0: i32, %arg1: i32, %arg2: memref<2x32x128xbf16, #tpu.memory_space<vmem>>, %arg3: memref<128x128xbf16, #tpu.memory_space<vmem>>, %arg4: memref<256x128xbf16, #tpu.memory_space<vmem>>, %arg5: memref<1x128xf32, #tpu.memory_space<vmem>>, %arg6: memref<32x128xf32, #tpu.memory_space<vmem>>, %arg7: memref<32x256xf32, #tpu.memory_space<vmem>>) attributes {dimension_semantics = [#tpu.dimension_semantics<parallel>, #tpu.dimension_semantics<arbitrary>], iteration_bounds = array<i64: 1, 1>, scalar_prefetch = 0 : i64, scratch_operands = 1 : i64, tpu.core_type = #tpu.core_type<tc>, window_params = [{transform_indices = @transform_0, window_bounds = array<i64: 2, 32, 128>}, {transform_indices = @transform_1, window_bounds = array<i64: 128, 128>}, {pipeline_mode = #tpu.pipeline_mode<synchronous>, transform_indices = @transform_2, window_bounds = array<i64: 256, 128>}, {pipeline_mode = #tpu.pipeline_mode<synchronous>, transform_indices = @transform_3, window_bounds = array<i64: 1, 128>}, {transform_indices = @transform_4, window_bounds = array<i64: 32, 128>}]} {
    %c0_i32 = arith.constant 0 : i32
    %0 = arith.cmpi eq, %arg1, %c0_i32 : i32
    %1 = arith.extui %0 : i1 to i32
    %c0_i32_0 = arith.constant 0 : i32
    %2 = arith.cmpi ne, %1, %c0_i32_0 : i32
    scf.if %2 {
      %cst_17 = arith.constant 0.000000e+00 : f32
      %19 = vector.broadcast %cst_17 : f32 to vector<32x256xf32>
      %c0_18 = arith.constant 0 : index
      %c0_19 = arith.constant 0 : index
      %20 = vector.load %arg7[%c0_18, %c0_19] : memref<32x256xf32, #tpu.memory_space<vmem>>, vector<32x256xf32>
      tpu.vector_store %arg7[%c0_18, %c0_19], %19 {strides = array<i32>} : memref<32x256xf32, #tpu.memory_space<vmem>>, vector<32x256xf32>,
    } else {
    }
    %c0 = arith.constant 0 : index
    %c0_1 = arith.constant 0 : index
    %3 = vector.load %arg3[%c0, %c0_1] : memref<128x128xbf16, #tpu.memory_space<vmem>>, vector<128x128xbf16>
    %c0_2 = arith.constant 0 : index
    %c0_3 = arith.constant 0 : index
    %4 = vector.load %arg7[%c0_2, %c0_3] : memref<32x256xf32, #tpu.memory_space<vmem>>, vector<32x128xf32>
    %c0_4 = arith.constant 0 : index
    %c0_5 = arith.constant 0 : index
    %c0_6 = arith.constant 0 : index
    %5 = vector.load %arg2[%c0_4, %c0_5, %c0_6] : memref<2x32x128xbf16, #tpu.memory_space<vmem>>, vector<1x32x128xbf16>
    %6 = vector.shape_cast %5 : vector<1x32x128xbf16> to vector<32x128xbf16>
    %cst = arith.constant dense<0.000000e+00> : vector<32x128xf32>
    %7 = tpu.matmul %6, %3, %cst {dimension_numbers = #tpu.dot_dimension_numbers<[1], [0], [0], [1], [0, 0, 1, 1], [], []>} : vector<32x128xbf16>, vector<128x128xbf16>, vector<32x128xf32> -> vector<32x128xf32>
    %8 = arith.addf %4, %7 : vector<32x128xf32>
    %c0_7 = arith.constant 0 : index
    %c0_8 = arith.constant 0 : index
    %9 = vector.load %arg7[%c0_7, %c0_8] : memref<32x256xf32, #tpu.memory_space<vmem>>, vector<32x128xf32>
    tpu.vector_store %arg7[%c0_7, %c0_8], %8 {strides = array<i32>} : memref<32x256xf32, #tpu.memory_space<vmem>>, vector<32x128xf32>,
    %c0_9 = arith.constant 0 : index
    %c128 = arith.constant 128 : index
    %10 = vector.load %arg7[%c0_9, %c128] : memref<32x256xf32, #tpu.memory_space<vmem>>, vector<32x128xf32>
    %c1 = arith.constant 1 : index
    %c0_10 = arith.constant 0 : index
    %c0_11 = arith.constant 0 : index
    %11 = vector.load %arg2[%c1, %c0_10, %c0_11] : memref<2x32x128xbf16, #tpu.memory_space<vmem>>, vector<1x32x128xbf16>
    %12 = vector.shape_cast %11 : vector<1x32x128xbf16> to vector<32x128xbf16>
    %cst_12 = arith.constant dense<0.000000e+00> : vector<32x128xf32>
    %13 = tpu.matmul %12, %3, %cst_12 {dimension_numbers = #tpu.dot_dimension_numbers<[1], [0], [0], [1], [0, 0, 1, 1], [], []>} : vector<32x128xbf16>, vector<128x128xbf16>, vector<32x128xf32> -> vector<32x128xf32>
    %14 = arith.addf %10, %13 : vector<32x128xf32>
    %c0_13 = arith.constant 0 : index
    %c128_14 = arith.constant 128 : index
    %15 = vector.load %arg7[%c0_13, %c128_14] : memref<32x256xf32, #tpu.memory_space<vmem>>, vector<32x128xf32>
    tpu.vector_store %arg7[%c0_13, %c128_14], %14 {strides = array<i32>} : memref<32x256xf32, #tpu.memory_space<vmem>>, vector<32x128xf32>,
    %c0_i32_15 = arith.constant 0 : i32
    %16 = arith.cmpi eq, %arg1, %c0_i32_15 : i32
    %17 = arith.extui %16 : i1 to i32
    %c0_i32_16 = arith.constant 0 : i32
    %18 = arith.cmpi ne, %17, %c0_i32_16 : i32
    scf.if %18 {
      %c0_17 = arith.constant 0 : index
      %c0_18 = arith.constant 0 : index
      %19 = vector.load %arg7[%c0_17, %c0_18] : memref<32x256xf32, #tpu.memory_space<vmem>>, vector<32x256xf32>
      %20 = arith.truncf %19 : vector<32x256xf32> to vector<32x256xbf16>
      %c0_19 = arith.constant 0 : index
      %c0_20 = arith.constant 0 : index
      %21 = vector.load %arg4[%c0_19, %c0_20] : memref<256x128xbf16, #tpu.memory_space<vmem>>, vector<256x128xbf16>
      %cst_21 = arith.constant dense<0.000000e+00> : vector<32x128xf32>
      %22 = tpu.matmul %20, %21, %cst_21 {dimension_numbers = #tpu.dot_dimension_numbers<[1], [0], [0], [1], [0, 0, 1, 1], [], []>} : vector<32x256xbf16>, vector<256x128xbf16>, vector<32x128xf32> -> vector<32x128xf32>
      %c0_22 = arith.constant 0 : index
      %c0_23 = arith.constant 0 : index
      %23 = vector.load %arg5[%c0_22, %c0_23] : memref<1x128xf32, #tpu.memory_space<vmem>>, vector<1x128xf32>
      %24 = vector.broadcast %23 : vector<1x128xf32> to vector<32x128xf32>
      %25 = arith.addf %22, %24 : vector<32x128xf32>
      %cst_24 = arith.constant 0.000000e+00 : f32
      %26 = vector.broadcast %cst_24 : f32 to vector<32x128xf32>
      %27 = arith.maximumf %25, %26 : vector<32x128xf32>
      %c0_25 = arith.constant 0 : index
      %c0_26 = arith.constant 0 : index
      %28 = vector.load %arg6[%c0_25, %c0_26] : memref<32x128xf32, #tpu.memory_space<vmem>>, vector<32x128xf32>
      tpu.vector_store %arg6[%c0_25, %c0_26], %27 {strides = array<i32>} : memref<32x128xf32, #tpu.memory_space<vmem>>, vector<32x128xf32>,
    } else {
    }
    return
  }
  func.func @transform_0(%arg0: i32, %arg1: i32) -> (i32, i32, i32) {
    %c0_i32 = arith.constant 0 : i32
    %c0_i32_0 = arith.constant 0 : i32
    return %c0_i32, %arg0, %arg1 : i32, i32, i32
  }
  func.func @transform_1(%arg0: i32, %arg1: i32) -> (i32, i32) {
    %c0_i32 = arith.constant 0 : i32
    %c0_i32_0 = arith.constant 0 : i32
    return %arg1, %c0_i32 : i32, i32
  }
  func.func @transform_2(%arg0: i32, %arg1: i32) -> (i32, i32) {
    %c0_i32 = arith.constant 0 : i32
    %c0_i32_0 = arith.constant 0 : i32
    %c0_i32_1 = arith.constant 0 : i32
    return %c0_i32, %c0_i32_0 : i32, i32
  }
  func.func @transform_3(%arg0: i32, %arg1: i32) -> (i32, i32) {
    %c0_i32 = arith.constant 0 : i32
    %c0_i32_0 = arith.constant 0 : i32
    %c0_i32_1 = arith.constant 0 : i32
    return %c0_i32, %c0_i32_0 : i32, i32
  }
  func.func @transform_4(%arg0: i32, %arg1: i32) -> (i32, i32) {
    %c0_i32 = arith.constant 0 : i32
    %c0_i32_0 = arith.constant 0 : i32
    return %arg0, %c0_i32 : i32, i32
  }
}

</mosaic_0001>

<bundles_post_ra>
// kernel: tpu_custom_call.1
= control target key start
LH: loop header
LB: loop body
LE: loop exit
PB: predicated region body
PF: predicated region fallthrough
CT: control target
= control target key end

     0   :  { %9 = vsyncpa [#allocation4], 0  ;;  %s863_s0 = inlined_call_operand.hbm [shape: bf16[2,32,128], index: 0, kind: input, shape index: {}]   ;;  %s864_s1 = inlined_call_operand.hbm [shape: bf16[128,128], index: 1, kind: input, shape index: {}]   ;;  %s865_s2 = inlined_call_operand.hbm [shape: bf16[256,128], index: 2, kind: input, shape index: {}]   ;;  %s866_s3 = inlined_call_operand.vmem [shape: f32[1,128], index: 3, kind: input, shape index: {}]   ;;  %s867_s4 = inlined_call_operand.hbm [shape: f32[32,128], index: 4, kind: output, shape index: {}]  }
   0x1   :  { %10 = vsyncpa [#allocation7], 0 }
   0x2   :  { %11 = vsyncpa [#allocation5], 0  ;;  %s763_s15 = smov [#allocation6]   ;;  %s764_s17 = smov [#allocation3]  }
   0x3   :  { %s29_s16 = sshll.u32 %s763_s15, 4  ;;  %s17_s18 = sshll.u32 %s764_s17, 4  ;;  %s30_s16 = int_to_ptr.vmem [resolvable:$true] %s29_s16  ;;  %s796_s18 = int_to_ptr.vmem [resolvable:$true] %s17_s18 }
   0x4   :  { %s669_s21 = scalar_lea.hbm %s864_s1, 1024 }
   0x5   :  { %p670_p0 = scmp.ne.s32.totalorder %s864_s1, %s669_s21  ;;  %p673_p1 = scmp.lt.u32.totalorder %s669_s21, %s864_s1 }
   0x7   :  { %p675_p2 = pnand %p673_p1, %p670_p0 }
   0x9   :  { %678 = shalt.err (!%p675_p2)
}
   0xa   :  { %s679_s26 = scalar_lea.vmem %s30_s16, 1024  ;;  %p684_p4 = scmp.lt.s32.totalorder %s30_s16, %s30_s16 }
   0xb   :  { %p680_p3 = scmp.ne.s32.totalorder %s30_s16, %s679_s26  ;;  %p685_p5 = scmp.lt.s32.totalorder %s679_s26, %s679_s26 }
   0xd   :  { %p686_p6 = por %p685_p5, %p684_p4 }
   0xf   :  { %p687_p7 = pnand %p686_p6, %p680_p3 }
  0x11   :  { %690 = shalt.err (!%p687_p7)
}
  0x12   :  { %s765_s27 = smov 64   ;;  %s766_s28 = smov 4  }
  0x13   :  { %35 = dma.hbm_to_vmem [thread:$0]  %s864_s1, 1024, %s30_s16, [#allocation7], %s765_s27, %s765_s27, %s766_s28  }
  0x14   :  { %s691_s7 = scalar_lea.hbm %s863_s0, 512 }
  0x15   :  { %p692_p8 = scmp.ne.s32.totalorder %s863_s0, %s691_s7  ;;  %p695_p9 = scmp.lt.u32.totalorder %s691_s7, %s863_s0 }
  0x17   :  { %p697_p10 = pnand %p695_p9, %p692_p8 }
  0x19   :  { %700 = shalt.err (!%p697_p10)
}
  0x1a   :  { %s701_s12 = scalar_lea.vmem %s796_s18, 512  ;;  %p706_p12 = scmp.lt.s32.totalorder %s796_s18, %s796_s18 }
  0x1b   :  { %p702_p11 = scmp.ne.s32.totalorder %s796_s18, %s701_s12  ;;  %p707_p13 = scmp.lt.s32.totalorder %s701_s12, %s701_s12 }
  0x1d   :  { %p708_p0 = por %p707_p13, %p706_p12 }
  0x1f   :  { %p709_p1 = pnand %p708_p0, %p702_p11 }
  0x21   :  { %712 = shalt.err (!%p709_p1)
}
  0x22   :  { %23 = dma.hbm_to_vmem [thread:$0]  %s863_s0, 512, %s796_s18, [#allocation4], %s765_s27, %s765_s27, %s766_s28  }
  0x23   :  { %s767_s14 = smov [#allocation8]   ;;  %s713_s19 = scalar_lea.hbm %s865_s2, 2048 }
  0x24   :  { %s41_s15 = sshll.u32 %s767_s14, 4  ;;  %p714_p2 = scmp.ne.s32.totalorder %s865_s2, %s713_s19  ;;  %s42_s15 = int_to_ptr.vmem [resolvable:$true] %s41_s15 }
  0x25   :  { %p717_p3 = scmp.lt.u32.totalorder %s713_s19, %s865_s2 }
  0x27   :  { %p719_p4 = pnand %p717_p3, %p714_p2 }
  0x29   :  { %722 = shalt.err (!%p719_p4)
}
  0x2a   :  { %s723_s24 = scalar_lea.vmem %s42_s15, 2048  ;;  %p728_p6 = scmp.lt.s32.totalorder %s42_s15, %s42_s15 }
  0x2b   :  { %p724_p5 = scmp.ne.s32.totalorder %s42_s15, %s723_s24  ;;  %p729_p7 = scmp.lt.s32.totalorder %s723_s24, %s723_s24 }
  0x2d   :  { %p730_p8 = por %p729_p7, %p728_p6 }
  0x2f   :  { %p731_p9 = pnand %p730_p8, %p724_p5 }
  0x31   :  { %734 = shalt.err (!%p731_p9)
}
  0x32   :  { %47 = dma.hbm_to_vmem [thread:$0]  %s865_s2, 2048, %s42_s15, [#allocation7], %s765_s27, %s765_s27, %s766_s28  }
  0x33   :  { %757 = dma.done.wait [#allocation4], 512  }
  0x34   :  { %758 = vsyncadd [#allocation4], 4294966784 }
  0x35   :  { %759 = dma.done.wait [#allocation7], 3072  }
  0x36   :  { %760 = vsyncadd [#allocation7], 4294964224  ;;  %v641_v0 = vld [vmem:[#allocation6] sm:$0xff]   ;;  %v642_v1 = vld [vmem:[#allocation6 + $0x8] sm:$0xff]   ;;  %s768_s26 = smov [#allocation9]  }
  0x37   :  { %593 = vmatprep.subr.bf16.mxu1 %v641_v0  ;;  %v643_v2 = vld [vmem:[#allocation6 + $0x10] sm:$0xff]   ;;  %v644_v3 = vld [vmem:[#allocation6 + $0x18] sm:$0xff]   ;;  %v649_v4 = vld [vmem:[#allocation3] sm:$0xff]  }
  0x38   :  { %594 = vmatpush3.bf16.msra.mxu1 %v641_v0  ;;  %609 = vmatprep.mubr.bf16.mxu1 %v649_v4  ;;  %v645_v5 = vld [vmem:[#allocation6 + $0x20] sm:$0xff]   ;;  %v646_v6 = vld [vmem:[#allocation6 + $0x28] sm:$0xff]   ;;  %v647_v7 = vld [vmem:[#allocation6 + $0x30] sm:$0xff]  }
  0x39   :  { %595 = vmatprep.subr.bf16.mxu1 %v642_v1  ;;  %v648_v8 = vld [vmem:[#allocation6 + $0x38] sm:$0xff]   ;;  %v650_v9 = vld [vmem:[#allocation3 + $0x8] sm:$0xff]   ;;  %v651_v10 = vld [vmem:[#allocation3 + $0x10] sm:$0xff]  }
  0x3a   :  { %v652_v11 = vld [vmem:[#allocation3 + $0x18] sm:$0xff]   ;;  %v653_v12 = vld [vmem:[#allocation8 + $0x40] sm:$0xff]   ;;  %v655_v14 = vld [vmem:[#allocation8 + $0x48] sm:$0xff]  }
  0x3b   :  { %v654_v13 = vld [vmem:[#allocation8] sm:$0xff]   ;;  %565 = vmatprep.subr.bf16.mxu0 %v653_v12  ;;  %v656_v15 = vld [vmem:[#allocation8 + $0x8] sm:$0xff]   ;;  %v657_v16 = vld [vmem:[#allocation8 + $0x50] sm:$0xff]  }
  0x3c   :  { %596 = vmatpush3.bf16.msra.mxu1 %v642_v1  ;;  %566 = vmatpush3.bf16.msra.mxu0 %v654_v13  ;;  %v658_v17 = vld [vmem:[#allocation8 + $0x10] sm:$0xff]   ;;  %v659_v18 = vld [vmem:[#allocation8 + $0x58] sm:$0xff]   ;;  %v661_v20 = vld [vmem:[#allocation8 + $0x60] sm:$0xff]  }
  0x3d   :  { %597 = vmatprep.subr.bf16.mxu1 %v643_v2  ;;  %567 = vmatprep.subr.bf16.mxu0 %v655_v14  ;;  %v660_v19 = vld [vmem:[#allocation8 + $0x18] sm:$0xff]   ;;  %v662_v21 = vld [vmem:[#allocation8 + $0x20] sm:$0xff]   ;;  %v663_v22 = vld [vmem:[#allocation8 + $0x68] sm:$0xff]  }
  0x3e   :  { %v664_v23 = vld [vmem:[#allocation8 + $0x28] sm:$0xff]   ;;  %v665_v24 = vld [vmem:[#allocation8 + $0x70] sm:$0xff]   ;;  %v667_v26 = vld [vmem:[#allocation8 + $0x78] sm:$0xff]  }
  0x3f   :  { %v666_v25 = vld [vmem:[#allocation8 + $0x30] sm:$0xff]   ;;  %v668_v27 = vld [vmem:[#allocation8 + $0x38] sm:$0xff]   ;;  %v528_v41 = vld [vmem:[%s866_s3] ss:$0 sm:$0xff]  ;;  %s503_s3 = sshll.u32 %s768_s26, 4  ;;  %s504_s3 = int_to_ptr.vmem [resolvable:$true] %s503_s3 }
  0x40   :  { %598 = vmatpush3.bf16.msra.mxu1 %v643_v2  ;;  %568 = vmatpush3.bf16.msra.mxu0 %v656_v15  ;;  %s735_s27 = scalar_lea.vmem %s504_s3, 512  ;;  %p740_p11 = scmp.lt.s32.totalorder %s504_s3, %s504_s3 }
  0x41   :  { %599 = vmatprep.subr.bf16.mxu1 %v644_v3  ;;  %569 = vmatprep.subr.bf16.mxu0 %v657_v16  ;;  %p736_p10 = scmp.ne.s32.totalorder %s504_s3, %s735_s27  ;;  %p741_p12 = scmp.lt.s32.totalorder %s735_s27, %s735_s27 }
  0x43   :  { %p742_p13 = por %p741_p12, %p740_p11 }
  0x44   :  { %600 = vmatpush3.bf16.msra.mxu1 %v644_v3  ;;  %570 = vmatpush3.bf16.msra.mxu0 %v658_v17 }
  0x45   :  { %601 = vmatprep.subr.bf16.mxu1 %v645_v5  ;;  %571 = vmatprep.subr.bf16.mxu0 %v659_v18  ;;  %p743_p0 = pnand %p742_p13, %p736_p10 }
  0x48   :  { %602 = vmatpush3.bf16.msra.mxu1 %v645_v5  ;;  %572 = vmatpush3.bf16.msra.mxu0 %v660_v19 }
  0x49   :  { %603 = vmatprep.subr.bf16.mxu1 %v646_v6  ;;  %573 = vmatprep.subr.bf16.mxu0 %v661_v20 }
  0x4c   :  { %604 = vmatpush3.bf16.msra.mxu1 %v646_v6  ;;  %574 = vmatpush3.bf16.msra.mxu0 %v662_v21 }
  0x4d   :  { %605 = vmatprep.subr.bf16.mxu1 %v647_v7  ;;  %575 = vmatprep.subr.bf16.mxu0 %v663_v22 }
  0x50   :  { %606 = vmatpush3.bf16.msra.mxu1 %v647_v7  ;;  %576 = vmatpush3.bf16.msra.mxu0 %v664_v23 }
  0x51   :  { %607 = vmatprep.subr.bf16.mxu1 %v648_v8  ;;  %577 = vmatprep.subr.bf16.mxu0 %v665_v24 }
  0x54   :  { %608 = vmatpush3.bf16.msra.mxu1 %v648_v8  ;;  %578 = vmatpush3.bf16.msra.mxu0 %v666_v25 }
  0x55   :  { %613 = vmatprep.subr.bf16.mxu1 %v641_v0  ;;  %579 = vmatprep.subr.bf16.mxu0 %v667_v26 }
  0x57   :  { %610 = vmatmul.mubr.bf16.vlgmr.msra.gmra.mrb[0].mxu1 %v650_v9 }
  0x58   :  { %614 = vmatpush3.bf16.msra.mxu1 %v641_v0  ;;  %629 = vmatprep.mubr.bf16.mxu1 %v651_v10 }
  0x59   :  { %615 = vmatprep.subr.bf16.mxu1 %v642_v1  ;;  %580 = vmatpush3.bf16.msra.mxu0 %v668_v27 }
  0x5c   :  { %616 = vmatpush3.bf16.msra.mxu1 %v642_v1 }
  0x5d   :  { %617 = vmatprep.subr.bf16.mxu1 %v643_v2 }
  0x60   :  { %618 = vmatpush3.bf16.msra.mxu1 %v643_v2 }
  0x61   :  { %619 = vmatprep.subr.bf16.mxu1 %v644_v3 }
  0x64   :  { %620 = vmatpush3.bf16.msra.mxu1 %v644_v3 }
  0x65   :  { %621 = vmatprep.subr.bf16.mxu1 %v645_v5 }
  0x68   :  { %622 = vmatpush3.bf16.msra.mxu1 %v645_v5 }
  0x69   :  { %623 = vmatprep.subr.bf16.mxu1 %v646_v6 }
  0x6c   :  { %624 = vmatpush3.bf16.msra.mxu1 %v646_v6 }
  0x6d   :  { %625 = vmatprep.subr.bf16.mxu1 %v647_v7 }
  0x70   :  { %626 = vmatpush3.bf16.msra.mxu1 %v647_v7 }
  0x71   :  { %627 = vmatprep.subr.bf16.mxu1 %v648_v8 }
  0x74   :  { %628 = vmatpush3.bf16.msra.mxu1 %v648_v8 }
  0x77   :  { %630 = vmatmul.mubr.bf16.vlgmr.msra.gmra.mrb[4].mxu1 %v652_v11 }
 0x12a   :  { %v611_v28 = vpop.f32.mrb[0].mxu1 }
 0x12b   :  { %v190_v29 = vpop.f32.mrb[1].mxu1 }
 0x12c   :  { %v612_v30 = vpop.f32.mrb[2].mxu1 }
 0x12d   :  { %v304_v31 = vpack.c.bf16 %v612_v30, %v611_v28  ;;  %v193_v32 = vpop.f32.mrb[3].mxu1 }
 0x12e   :  { %v302_v33 = vpack.c.bf16 %v193_v32, %v190_v29 }
 0x14a   :  { %v631_v34 = vpop.f32.mrb[4].mxu1 }
 0x14b   :  { %v268_v35 = vpop.f32.mrb[5].mxu1 }
 0x14c   :  { %v632_v36 = vpop.f32.mrb[6].mxu1 }
 0x14d   :  { %v305_v37 = vpack.c.bf16 %v632_v36, %v631_v34  ;;  %v271_v38 = vpop.f32.mrb[7].mxu1 }
 0x14e   :  { %v303_v39 = vpack.c.bf16 %v271_v38, %v268_v35 }
 0x150   :  { %473 = vmatprep.mubr.bf16.mxu0 %v303_v39 }
 0x151   :  { %474 = vmatmul.mubr.bf16.vlgmr.msra.gmra.mrb[0].mxu0 %v302_v33 }
 0x152   :  { %481 = vmatprep.mubr.bf16.mxu0 %v305_v37 }
 0x159   :  { %482 = vmatmul.mubr.bf16.gmra.mrb[4].mxu0 %v304_v31 }
 0x224   :  { %v581_v40 = vpop.f32.mrb[0].mxu0 }
 0x225   :  { %v582_v42 = vpop.f32.mrb[1].mxu0 }
 0x226   :  { %v583_v43 = vadd.f32 %v582_v42, %v581_v40  ;;  %v584_v44 = vpop.f32.mrb[2].mxu0 }
 0x227   :  { %v585_v45 = vpop.f32.mrb[3].mxu0 }
 0x228   :  { %v476_v46 = vadd.f32 %v583_v43, %v528_v41  ;;  %v586_v47 = vadd.f32 %v585_v45, %v584_v44 }
 0x22a   :  { %v490_v48 = vmax.f32 %v476_v46, 0.0  ;;  %v479_v49 = vadd.f32 %v586_v47, %v528_v41 }
 0x22c   :  { %494 = vst [vmem:[#allocation9] sm:$0xff] %v490_v48  ;;  %v491_v50 = vmax.f32 %v479_v49, 0.0  ;;  %v587_v51 = vpop.f32.mrb[4].mxu0 }
 0x22d   :  { %v588_v52 = vpop.f32.mrb[5].mxu0 }
 0x22e   :  { %495 = vst [vmem:[#allocation9 + $0x8] sm:$0xff] %v491_v50  ;;  %v589_v53 = vadd.f32 %v588_v52, %v587_v51  ;;  %v590_v54 = vpop.f32.mrb[6].mxu0 }
 0x22f   :  { %v591_v55 = vpop.f32.mrb[7].mxu0 }
 0x230   :  { %v484_v56 = vadd.f32 %v589_v53, %v528_v41  ;;  %v592_v57 = vadd.f32 %v591_v55, %v590_v54 }
 0x232   :  { %v492_v58 = vmax.f32 %v484_v56, 0.0  ;;  %v487_v59 = vadd.f32 %v592_v57, %v528_v41 }
 0x234   :  { %496 = vst [vmem:[#allocation9 + $0x10] sm:$0xff] %v492_v58  ;;  %v493_v60 = vmax.f32 %v487_v59, 0.0 }
 0x236   :  { %497 = vst [vmem:[#allocation9 + $0x18] sm:$0xff] %v493_v60 }
 0x237   :  { %746 = shalt.err (!%p743_p0)
}
 0x238   :  { %s747_s30 = scalar_lea.hbm %s867_s4, 512 }
 0x239   :  { %p748_p1 = scmp.ne.s32.totalorder %s867_s4, %s747_s30  ;;  %p751_p2 = scmp.lt.u32.totalorder %s747_s30, %s867_s4 }
 0x23b   :  { %p753_p3 = pnand %p751_p2, %p748_p1 }
 0x23d   :  { %756 = shalt.err (!%p753_p3)
}
 0x23e   :  { %s769_s9 = smov 128   ;;  %s770_s10 = smov 8  }
 0x23f   :  { %509 = dma.vmem_to_hbm [thread:$0]  %s504_s3, 512, %s867_s4, [#allocation5], %s769_s9, %s769_s9, %s770_s10  }
 0x240   :  { %761 = dma.done.wait [#allocation5], 512  }
 0x241   :  { %762 = vsyncadd [#allocation5], 4294966784 }
 0x242   :  { %513 = vsyncpa [#allocation4], 1 }
 0x243   :  { %514 = vsyncpa [#allocation7], 1 }
 0x244   :  { %515 = vsyncpa [#allocation5], 1 }

</bundles_post_ra>
